<compile_context>
chip_gen: v6e
topology: v6e:2x2x1
jax: 0.10.0
libtpu: 0.0.40
codegen_flags: <defaults>
</compile_context>

<pallas_src>
import functools

import jax
import jax.numpy as jnp
from jax.experimental import pallas as pl
from jax.experimental.pallas import tpu as pltpu

_SUBLANE = 8


def _round_up(n, m):
    return ((n + m - 1) // m) * m


def _autoencoder_kernel(x_ref,
                        w1_ref, b1_ref,   # encoder linear 1: (D, H), (1, H)
                        w2_ref, b2_ref,   # encoder linear 2: (H, L), (1, L)
                        w3_ref, b3_ref,   # decoder linear 1: (L, H), (1, H)
                        w4_ref, b4_ref,   # decoder linear 2: (H, D), (1, D)
                        enc_ref, dec_ref, loss_ref,
                        *, batch, tile_m, mask_rows):
    x = x_ref[...]

    # Encoder: Linear -> ReLU -> Linear (f32 MXU accumulation throughout).
    h1 = jnp.dot(x, w1_ref[...], preferred_element_type=jnp.float32) + b1_ref[...]
    h1 = jnp.maximum(h1, 0.0)
    enc = jnp.dot(h1, w2_ref[...], preferred_element_type=jnp.float32) + b2_ref[...]

    # Decoder: Linear -> ReLU -> Linear.
    h2 = jnp.dot(enc, w3_ref[...], preferred_element_type=jnp.float32) + b3_ref[...]
    h2 = jnp.maximum(h2, 0.0)
    dec = jnp.dot(h2, w4_ref[...], preferred_element_type=jnp.float32) + b4_ref[...]

    enc_ref[...] = enc.astype(enc_ref.dtype)
    dec_ref[...] = dec.astype(dec_ref.dtype)

    # Per-tile partial sum of squared reconstruction error.  Rows past the real
    # batch (the ragged last tile reads undefined boundary data) are masked to
    # exactly zero before squaring, so they contribute nothing; boundary rows
    # of enc/dec are never written back by Pallas.
    diff = dec - x
    if mask_rows:
        row = (jax.lax.broadcasted_iota(jnp.int32, diff.shape, 0)
               + pl.program_id(0) * tile_m)
        diff = jnp.where(row < batch, diff, 0.0)
    sq = diff * diff                                           # (tile_m, D)
    d = sq.shape[-1]
    # Collapse sublane-tile groups -> one 8-row, lane-aligned partial block.
    loss_ref[...] = sq.reshape(tile_m // _SUBLANE, _SUBLANE, d).sum(axis=0)


def prepare_params(params):
    """One-time parameter prep (call once, reuse across forward calls).

    Casts everything to f32 and reshapes biases to (1, out) rows so the kernel
    broadcasts them lane-wise.  Linear weights are stored (in_features,
    out_features), i.e. already transposed w.r.t. PyTorch's nn.Linear storage.
    """
    f32 = jnp.float32
    return {
        "w1": params["w1"].astype(f32), "b1": params["b1"].reshape(1, -1).astype(f32),
        "w2": params["w2"].astype(f32), "b2": params["b2"].reshape(1, -1).astype(f32),
        "w3": params["w3"].astype(f32), "b3": params["b3"].reshape(1, -1).astype(f32),
        "w4": params["w4"].astype(f32), "b4": params["b4"].reshape(1, -1).astype(f32),
    }


def _choose_tile_m(batch):
    if batch <= 256:
        # Single tile: per-grid-step overhead (~0.35 us) dominates tiny batches.
        return max(_round_up(batch, _SUBLANE), _SUBLANE)
    # >= 2 tiles so the "parallel" batch axis can shard across both TensorCores
    # on v7x; cap at 512 rows (near-roofline tile size for mem-bound kernels).
    return min(_round_up(-(-batch // 2), _SUBLANE), 512)


def autoencoder_compressor(x, prep, *, tile_m=None):
    """Forward pass of AutoEncoderCompressor as one fused Pallas kernel.

    x    : (B, input_dim) float array
    prep : output of prepare_params (prepared once, reused every call)
    returns (encoder, decoder, loss) matching the PyTorch module.
    """
    B, D = x.shape
    H = prep["w1"].shape[1]
    L = prep["w2"].shape[1]

    if tile_m is None:
        tile_m = _choose_tile_m(B)
    tile_m = _round_up(tile_m, _SUBLANE)
    n_tiles = pl.cdiv(B, tile_m)

    f32 = jnp.float32
    x = x.astype(f32)

    const = lambda i: (0, 0)    # weights / biases: same (only) block every step
    rowmap = lambda i: (i, 0)   # batch-tiled arrays

    kernel = functools.partial(_autoencoder_kernel, batch=B, tile_m=tile_m,
                               mask_rows=(B % tile_m != 0))

    enc, dec, loss_partial = pl.pallas_call(
        kernel,
        out_shape=(
            jax.ShapeDtypeStruct((B, L), f32),                    # encoder
            jax.ShapeDtypeStruct((B, D), f32),                    # decoder
            jax.ShapeDtypeStruct((n_tiles * _SUBLANE, D), f32),   # SSE partials
        ),
        grid_spec=pltpu.PrefetchScalarGridSpec(
            num_scalar_prefetch=0,
            grid=(n_tiles,),
            in_specs=[
                pl.BlockSpec((tile_m, D), rowmap),   # x tile
                pl.BlockSpec((D, H), const),         # w1 (full-array block)
                pl.BlockSpec((1, H), const),         # b1
                pl.BlockSpec((H, L), const),         # w2
                pl.BlockSpec((1, L), const),         # b2
                pl.BlockSpec((L, H), const),         # w3
                pl.BlockSpec((1, H), const),         # b3
                pl.BlockSpec((H, D), const),         # w4
                pl.BlockSpec((1, D), const),         # b4
            ],
            out_specs=[
                pl.BlockSpec((tile_m, L), rowmap),     # encoder (exact width)
                pl.BlockSpec((tile_m, D), rowmap),     # decoder (exact width)
                pl.BlockSpec((_SUBLANE, D), rowmap),   # per-tile loss partials
            ],
        ),
        compiler_params=pltpu.CompilerParams(
            # Tiles are fully independent (loss is per-tile), so the batch axis
            # can shard across TensorCores on v7x.
            dimension_semantics=("parallel",),
        ),
    )(x, prep["w1"], prep["b1"], prep["w2"], prep["b2"],
      prep["w3"], prep["b3"], prep["w4"], prep["b4"])

    loss = jnp.sum(loss_partial) / jnp.float32(B * D)
    return enc, dec, loss


def init_params(key, input_dim, hidden_dim, latent_dim):
    """Deterministic PyTorch-style init: U(-1/sqrt(fan_in), 1/sqrt(fan_in))."""
    def linear(k, fan_in, fan_out):
        kw, kb = jax.random.split(k)
        bound = 1.0 / jnp.sqrt(fan_in)
        w = jax.random.uniform(kw, (fan_in, fan_out), jnp.float32, -bound, bound)
        b = jax.random.uniform(kb, (fan_out,), jnp.float32, -bound, bound)
        return w, b

    k1, k2, k3, k4 = jax.random.split(key, 4)
    w1, b1 = linear(k1, input_dim, hidden_dim)
    w2, b2 = linear(k2, hidden_dim, latent_dim)
    w3, b3 = linear(k3, latent_dim, hidden_dim)
    w4, b4 = linear(k4, hidden_dim, input_dim)
    return dict(w1=w1, b1=b1, w2=w2, b2=b2, w3=w3, b3=b3, w4=w4, b4=b4)


def reference_forward(x, p):
    h1 = jnp.maximum(x @ p["w1"] + p["b1"], 0.0)
    enc = h1 @ p["w2"] + p["b2"]
    h2 = jnp.maximum(enc @ p["w3"] + p["b3"], 0.0)
    dec = h2 @ p["w4"] + p["b4"]
    loss = jnp.mean((dec - x) ** 2)
    return enc, dec, loss


if __name__ == "__main__":
    input_dim, hidden_dim, latent_dim = 64, 32, 16

    key = jax.random.PRNGKey(0)
    kx, kp, kx2, kx3 = jax.random.split(key, 4)
    params = init_params(kp, input_dim, hidden_dim, latent_dim)
    prep = prepare_params(params)          # one-time prep, reused below
    fwd = jax.jit(autoencoder_compressor)

    def check(x, loss_rtol=1e-5):
        enc, dec, loss = fwd(x, prep)
        jax.block_until_ready((enc, dec, loss))
        enc_r, dec_r, loss_r = reference_forward(x, params)
        assert enc.shape == enc_r.shape and dec.shape == dec_r.shape
        assert jnp.allclose(enc, enc_r, atol=1e-5, rtol=1e-5)
        assert jnp.allclose(dec, dec_r, atol=1e-5, rtol=1e-5)
        assert jnp.allclose(loss, loss_r, atol=1e-5, rtol=loss_rtol)

    # Case 1: 8-aligned batch, single tile.
    check(jax.random.normal(kx, (16, input_dim), jnp.float32))

    # Case 2: ragged batch, single partial tile (exercises the loss row mask
    # and boundary-block clamping on reads/writes).
    check(jax.random.normal(kx2, (13, input_dim), jnp.float32))

    # Case 3: multi-tile ragged batch (n_tiles=2, "parallel" axis + the
    # 8-sublane-aligned per-tile loss partial blocks).
    check(jax.random.normal(kx3, (333, input_dim), jnp.float32), loss_rtol=1e-4)

    print("KERNEL_OK")
</pallas_src>

<mosaic_0001>
module attributes {stable_mosaic.version = 11 : i64} {
  func.func @_autoencoder_kernel(%arg0: i32, %arg1: memref<16x64xf32, #tpu.memory_space<vmem>>, %arg2: memref<64x32xf32, #tpu.memory_space<vmem>>, %arg3: memref<1x32xf32, #tpu.memory_space<vmem>>, %arg4: memref<32x16xf32, #tpu.memory_space<vmem>>, %arg5: memref<1x16xf32, #tpu.memory_space<vmem>>, %arg6: memref<16x32xf32, #tpu.memory_space<vmem>>, %arg7: memref<1x32xf32, #tpu.memory_space<vmem>>, %arg8: memref<32x64xf32, #tpu.memory_space<vmem>>, %arg9: memref<1x64xf32, #tpu.memory_space<vmem>>, %arg10: memref<16x16xf32, #tpu.memory_space<vmem>>, %arg11: memref<16x64xf32, #tpu.memory_space<vmem>>, %arg12: memref<8x64xf32, #tpu.memory_space<vmem>>) attributes {dimension_semantics = [#tpu.dimension_semantics<parallel>], iteration_bounds = array<i64: 1>, scalar_prefetch = 0 : i64, scratch_operands = 0 : i64, tpu.core_type = #tpu.core_type<tc>, window_params = [{transform_indices = @transform_0, window_bounds = array<i64: 16, 64>}, {pipeline_mode = #tpu.pipeline_mode<synchronous>, transform_indices = @transform_1, window_bounds = array<i64: 64, 32>}, {pipeline_mode = #tpu.pipeline_mode<synchronous>, transform_indices = @transform_2, window_bounds = array<i64: 1, 32>}, {pipeline_mode = #tpu.pipeline_mode<synchronous>, transform_indices = @transform_3, window_bounds = array<i64: 32, 16>}, {pipeline_mode = #tpu.pipeline_mode<synchronous>, transform_indices = @transform_4, window_bounds = array<i64: 1, 16>}, {pipeline_mode = #tpu.pipeline_mode<synchronous>, transform_indices = @transform_5, window_bounds = array<i64: 16, 32>}, {pipeline_mode = #tpu.pipeline_mode<synchronous>, transform_indices = @transform_6, window_bounds = array<i64: 1, 32>}, {pipeline_mode = #tpu.pipeline_mode<synchronous>, transform_indices = @transform_7, window_bounds = array<i64: 32, 64>}, {pipeline_mode = #tpu.pipeline_mode<synchronous>, transform_indices = @transform_8, window_bounds = array<i64: 1, 64>}, {transform_indices = @transform_9, window_bounds = array<i64: 16, 16>}, {transform_indices = @transform_10, window_bounds = array<i64: 16, 64>}, {transform_indices = @transform_11, window_bounds = array<i64: 8, 64>}]} {
    %c0 = arith.constant 0 : index
    %c0_0 = arith.constant 0 : index
    %0 = vector.load %arg1[%c0, %c0_0] : memref<16x64xf32, #tpu.memory_space<vmem>>, vector<16x64xf32>
    %c0_1 = arith.constant 0 : index
    %c0_2 = arith.constant 0 : index
    %1 = vector.load %arg2[%c0_1, %c0_2] : memref<64x32xf32, #tpu.memory_space<vmem>>, vector<64x32xf32>
    %cst = arith.constant dense<0.000000e+00> : vector<16x32xf32>
    %2 = tpu.matmul %0, %1, %cst {dimension_numbers = #tpu.dot_dimension_numbers<[1], [0], [0], [1], [0, 0, 1, 1], [], []>} : vector<16x64xf32>, vector<64x32xf32>, vector<16x32xf32> -> vector<16x32xf32>
    %c0_3 = arith.constant 0 : index
    %c0_4 = arith.constant 0 : index
    %3 = vector.load %arg3[%c0_3, %c0_4] : memref<1x32xf32, #tpu.memory_space<vmem>>, vector<1x32xf32>
    %4 = vector.broadcast %3 : vector<1x32xf32> to vector<16x32xf32>
    %5 = arith.addf %2, %4 : vector<16x32xf32>
    %cst_5 = arith.constant 0.000000e+00 : f32
    %6 = vector.broadcast %cst_5 : f32 to vector<16x32xf32>
    %7 = arith.maximumf %5, %6 : vector<16x32xf32>
    %c0_6 = arith.constant 0 : index
    %c0_7 = arith.constant 0 : index
    %8 = vector.load %arg4[%c0_6, %c0_7] : memref<32x16xf32, #tpu.memory_space<vmem>>, vector<32x16xf32>
    %cst_8 = arith.constant dense<0.000000e+00> : vector<16x16xf32>
    %9 = tpu.matmul %7, %8, %cst_8 {dimension_numbers = #tpu.dot_dimension_numbers<[1], [0], [0], [1], [0, 0, 1, 1], [], []>} : vector<16x32xf32>, vector<32x16xf32>, vector<16x16xf32> -> vector<16x16xf32>
    %c0_9 = arith.constant 0 : index
    %c0_10 = arith.constant 0 : index
    %10 = vector.load %arg5[%c0_9, %c0_10] : memref<1x16xf32, #tpu.memory_space<vmem>>, vector<1x16xf32>
    %11 = vector.broadcast %10 : vector<1x16xf32> to vector<16x16xf32>
    %12 = arith.addf %9, %11 : vector<16x16xf32>
    %c0_11 = arith.constant 0 : index
    %c0_12 = arith.constant 0 : index
    %13 = vector.load %arg6[%c0_11, %c0_12] : memref<16x32xf32, #tpu.memory_space<vmem>>, vector<16x32xf32>
    %cst_13 = arith.constant dense<0.000000e+00> : vector<16x32xf32>
    %14 = tpu.matmul %12, %13, %cst_13 {dimension_numbers = #tpu.dot_dimension_numbers<[1], [0], [0], [1], [0, 0, 1, 1], [], []>} : vector<16x16xf32>, vector<16x32xf32>, vector<16x32xf32> -> vector<16x32xf32>
    %c0_14 = arith.constant 0 : index
    %c0_15 = arith.constant 0 : index
    %15 = vector.load %arg7[%c0_14, %c0_15] : memref<1x32xf32, #tpu.memory_space<vmem>>, vector<1x32xf32>
    %16 = vector.broadcast %15 : vector<1x32xf32> to vector<16x32xf32>
    %17 = arith.addf %14, %16 : vector<16x32xf32>
    %cst_16 = arith.constant 0.000000e+00 : f32
    %18 = vector.broadcast %cst_16 : f32 to vector<16x32xf32>
    %19 = arith.maximumf %17, %18 : vector<16x32xf32>
    %c0_17 = arith.constant 0 : index
    %c0_18 = arith.constant 0 : index
    %20 = vector.load %arg8[%c0_17, %c0_18] : memref<32x64xf32, #tpu.memory_space<vmem>>, vector<32x64xf32>
    %cst_19 = arith.constant dense<0.000000e+00> : vector<16x64xf32>
    %21 = tpu.matmul %19, %20, %cst_19 {dimension_numbers = #tpu.dot_dimension_numbers<[1], [0], [0], [1], [0, 0, 1, 1], [], []>} : vector<16x32xf32>, vector<32x64xf32>, vector<16x64xf32> -> vector<16x64xf32>
    %c0_20 = arith.constant 0 : index
    %c0_21 = arith.constant 0 : index
    %22 = vector.load %arg9[%c0_20, %c0_21] : memref<1x64xf32, #tpu.memory_space<vmem>>, vector<1x64xf32>
    %23 = vector.broadcast %22 : vector<1x64xf32> to vector<16x64xf32>
    %24 = arith.addf %21, %23 : vector<16x64xf32>
    %c0_22 = arith.constant 0 : index
    %c0_23 = arith.constant 0 : index
    %25 = vector.load %arg10[%c0_22, %c0_23] : memref<16x16xf32, #tpu.memory_space<vmem>>, vector<16x16xf32>
    tpu.vector_store %arg10[%c0_22, %c0_23], %12 {strides = array<i32>} : memref<16x16xf32, #tpu.memory_space<vmem>>, vector<16x16xf32>,
    %c0_24 = arith.constant 0 : index
    %c0_25 = arith.constant 0 : index
    %26 = vector.load %arg11[%c0_24, %c0_25] : memref<16x64xf32, #tpu.memory_space<vmem>>, vector<16x64xf32>
    tpu.vector_store %arg11[%c0_24, %c0_25], %24 {strides = array<i32>} : memref<16x64xf32, #tpu.memory_space<vmem>>, vector<16x64xf32>,
    %27 = arith.subf %24, %0 : vector<16x64xf32>
    %28 = arith.mulf %27, %27 : vector<16x64xf32>
    %29 = vector.shape_cast %28 : vector<16x64xf32> to vector<2x8x64xf32>
    %cst_26 = arith.constant dense<0.000000e+00> : vector<8x64xf32>
    %30 = vector.multi_reduction <add>, %29, %cst_26 [0] : vector<2x8x64xf32> to vector<8x64xf32>
    %c0_27 = arith.constant 0 : index
    %c0_28 = arith.constant 0 : index
    %31 = vector.load %arg12[%c0_27, %c0_28] : memref<8x64xf32, #tpu.memory_space<vmem>>, vector<8x64xf32>
    tpu.vector_store %arg12[%c0_27, %c0_28], %30 {strides = array<i32>} : memref<8x64xf32, #tpu.memory_space<vmem>>, vector<8x64xf32>,
    return
  }
  func.func @transform_0(%arg0: i32) -> (i32, i32) {
    %c0_i32 = arith.constant 0 : i32
    %c0_i32_0 = arith.constant 0 : i32
    return %arg0, %c0_i32 : i32, i32
  }
  func.func @transform_1(%arg0: i32) -> (i32, i32) {
    %c0_i32 = arith.constant 0 : i32
    %c0_i32_0 = arith.constant 0 : i32
    %c0_i32_1 = arith.constant 0 : i32
    return %c0_i32, %c0_i32_0 : i32, i32
  }
  func.func @transform_2(%arg0: i32) -> (i32, i32) {
    %c0_i32 = arith.constant 0 : i32
    %c0_i32_0 = arith.constant 0 : i32
    %c0_i32_1 = arith.constant 0 : i32
    return %c0_i32, %c0_i32_0 : i32, i32
  }
  func.func @transform_3(%arg0: i32) -> (i32, i32) {
    %c0_i32 = arith.constant 0 : i32
    %c0_i32_0 = arith.constant 0 : i32
    %c0_i32_1 = arith.constant 0 : i32
    return %c0_i32, %c0_i32_0 : i32, i32
  }
  func.func @transform_4(%arg0: i32) -> (i32, i32) {
    %c0_i32 = arith.constant 0 : i32
    %c0_i32_0 = arith.constant 0 : i32
    %c0_i32_1 = arith.constant 0 : i32
    return %c0_i32, %c0_i32_0 : i32, i32
  }
  func.func @transform_5(%arg0: i32) -> (i32, i32) {
    %c0_i32 = arith.constant 0 : i32
    %c0_i32_0 = arith.constant 0 : i32
    %c0_i32_1 = arith.constant 0 : i32
    return %c0_i32, %c0_i32_0 : i32, i32
  }
  func.func @transform_6(%arg0: i32) -> (i32, i32) {
    %c0_i32 = arith.constant 0 : i32
    %c0_i32_0 = arith.constant 0 : i32
    %c0_i32_1 = arith.constant 0 : i32
    return %c0_i32, %c0_i32_0 : i32, i32
  }
  func.func @transform_7(%arg0: i32) -> (i32, i32) {
    %c0_i32 = arith.constant 0 : i32
    %c0_i32_0 = arith.constant 0 : i32
    %c0_i32_1 = arith.constant 0 : i32
    return %c0_i32, %c0_i32_0 : i32, i32
  }
  func.func @transform_8(%arg0: i32) -> (i32, i32) {
    %c0_i32 = arith.constant 0 : i32
    %c0_i32_0 = arith.constant 0 : i32
    %c0_i32_1 = arith.constant 0 : i32
    return %c0_i32, %c0_i32_0 : i32, i32
  }
  func.func @transform_9(%arg0: i32) -> (i32, i32) {
    %c0_i32 = arith.constant 0 : i32
    %c0_i32_0 = arith.constant 0 : i32
    return %arg0, %c0_i32 : i32, i32
  }
  func.func @transform_10(%arg0: i32) -> (i32, i32) {
    %c0_i32 = arith.constant 0 : i32
    %c0_i32_0 = arith.constant 0 : i32
    return %arg0, %c0_i32 : i32, i32
  }
  func.func @transform_11(%arg0: i32) -> (i32, i32) {
    %c0_i32 = arith.constant 0 : i32
    %c0_i32_0 = arith.constant 0 : i32
    return %arg0, %c0_i32 : i32, i32
  }
}

</mosaic_0001>

<bundles_post_ra>
// kernel: autoencoder_compressor.1
= control target key start
LH: loop header
LB: loop body
LE: loop exit
PB: predicated region body
PF: predicated region fallthrough
CT: control target
= control target key end

     0   :  { %17 = vsyncpa [#allocation3], 0  ;;  %vm54_vm0 = vcmask 523264   ;;  %s762_s0 = inlined_call_operand.vmem [shape: f32[16,64], index: 0, kind: input, shape index: {}]   ;;  %s763_s1 = inlined_call_operand.vmem [shape: f32[64,32], index: 1, kind: input, shape index: {}]   ;;  %s764_s2 = inlined_call_operand.vmem [shape: f32[1,32], index: 2, kind: input, shape index: {}]   ;;  %s765_s3 = inlined_call_operand.vmem [shape: f32[32,16], index: 3, kind: input, shape index: {}]   ;;  %s766_s4 = inlined_call_operand.vmem [shape: f32[1,16], index: 4, kind: input, shape index: {}]   ;;  %s767_s5 = inlined_call_operand.vmem [shape: f32[16,32], index: 5, kind: input, shape index: {}]   ;;  %s768_s6 = inlined_call_operand.vmem [shape: f32[1,32], index: 6, kind: input, shape index: {}]   ;;  %s769_s7 = inlined_call_operand.vmem [shape: f32[32,64], index: 7, kind: input, shape index: {}]   ;;  %s770_s8 = inlined_call_operand.vmem [shape: f32[1,64], index: 8, kind: input, shape index: {}]   ;;  %s771_s9 = inlined_call_operand.hbm [shape: f32[16,16], index: 9, kind: output, shape index: {0}]   ;;  %s772_s10 = inlined_call_operand.hbm [shape: f32[16,64], index: 10, kind: output, shape index: {1}]   ;;  %s773_s11 = inlined_call_operand.vmem [shape: f32[8,64], index: 11, kind: output, shape index: {2}]  }
   0x1   :  { %v46_v0 = vld [vmem:[%s763_s1 + $0x38] sm:$0xff]  ;;  %v45_v1 = vld [vmem:[%s763_s1 + $0x30] sm:$0xff]  ;;  %v44_v2 = vld [vmem:[%s763_s1 + $0x28] sm:$0xff] }
   0x2   :  { %502 = vmatprep.subr.mxu0 %v46_v0  ;;  %v674_v3 = vld [vmem:[%s762_s0] sm:$0xff] }
   0x3   :  { %503 = vmatpush3.msra.mxu0 %v46_v0  ;;  %518 = vmatprep.mubr.msk.f32.mxu0 %vm54_vm0, %v674_v3 }
   0x4   :  { %504 = vmatprep.subr.mxu0 %v45_v1 }
   0x5   :  { %18 = vsyncpa [#allocation5], 0  ;;  %505 = vmatpush3.msra.mxu0 %v45_v1  ;;  %v43_v4 = vld [vmem:[%s763_s1 + $0x20] sm:$0xff]  ;;  %v42_v5 = vld [vmem:[%s763_s1 + $0x18] sm:$0xff]  ;;  %vm149_vm1 = vcmask 261120   ;;  %vm240_vm2 = vcmask 130048  }
   0x6   :  { %506 = vmatprep.subr.mxu0 %v44_v2  ;;  %v41_v6 = vld [vmem:[%s763_s1 + $0x10] sm:$0xff]  ;;  %v40_v7 = vld [vmem:[%s763_s1 + $0x8] sm:$0xff]  ;;  %v39_v8 = vld [vmem:[%s763_s1] sm:$0xff]  ;;  %s598_s19 = smov [#allocation2]  }
   0x7   :  { %507 = vmatpush3.msra.mxu0 %v44_v2  ;;  %v696_v9 = vld [vmem:[%s762_s0 + $0x8] sm:$0xff]  ;;  %v141_v10 = vld [vmem:[%s765_s3 + $0x18] sm:$0xff]  ;;  %v140_v11 = vld [vmem:[%s765_s3 + $0x10] sm:$0xff]  ;;  %s433_s20 = sshll.u32 %s598_s19, 4  ;;  %s434_s20 = int_to_ptr.vmem [resolvable:$true] %s433_s20 }
   0x8   :  { %508 = vmatprep.subr.mxu0 %v43_v4  ;;  %521 = vmatprep.subr.mxu1 %v141_v10  ;;  %v139_v12 = vld [vmem:[%s765_s3 + $0x8] sm:$0xff]  ;;  %v138_v13 = vld [vmem:[%s765_s3] sm:$0xff]  ;;  %v327_v28 = vld [vmem:[%s769_s7 + $0x18] sm:$0xff]  ;;  %p559_p1 = scmp.lt.s32.totalorder %s434_s20, %s434_s20 }
   0x9   :  { %509 = vmatpush3.msra.mxu0 %v43_v4  ;;  %522 = vmatpush3.msra.mxu1 %v141_v10  ;;  %v464_v14 = vld [vmem:[%s764_s2] ss:$0 sm:$0xff]  ;;  %v232_v21 = vld [vmem:[%s767_s5 + $0x8] sm:$0xff]  ;;  %v326_v29 = vld [vmem:[%s769_s7 + $0x10] sm:$0xff] }
   0xa   :  { %510 = vmatprep.subr.mxu0 %v42_v5  ;;  %523 = vmatprep.subr.mxu1 %v140_v11  ;;  %v231_v22 = vld [vmem:[%s767_s5] sm:$0xff]  ;;  %v325_v30 = vld [vmem:[%s769_s7 + $0x8] sm:$0xff] }
   0xb   :  { %511 = vmatpush3.msra.mxu0 %v42_v5  ;;  %524 = vmatpush3.msra.mxu1 %v140_v11  ;;  %v467_v23 = vld [vmem:[%s766_s4] ss:$0 sm:$0xff] }
   0xc   :  { %512 = vmatprep.subr.mxu0 %v41_v6  ;;  %525 = vmatprep.subr.mxu1 %v139_v12  ;;  %v324_v31 = vld [vmem:[%s769_s7] sm:$0xff]  ;;  %s554_s7 = scalar_lea.vmem %s434_s20, 256 }
   0xd   :  { %513 = vmatpush3.msra.mxu0 %v41_v6  ;;  %526 = vmatpush3.msra.mxu1 %v139_v12  ;;  %v470_v32 = vld [vmem:[%s768_s6] ss:$0 sm:$0xff]  ;;  %p555_p0 = scmp.ne.s32.totalorder %s434_s20, %s554_s7  ;;  %p560_p2 = scmp.lt.s32.totalorder %s554_s7, %s554_s7 }
   0xe   :  { %514 = vmatprep.subr.mxu0 %v40_v7  ;;  %527 = vmatprep.subr.mxu1 %v138_v13 }
   0xf   :  { %515 = vmatpush3.msra.mxu0 %v40_v7  ;;  %528 = vmatpush3.msra.mxu1 %v138_v13  ;;  %p561_p3 = por %p560_p2, %p559_p1 }
  0x10   :  { %516 = vmatprep.subr.mxu0 %v39_v8  ;;  %532 = vmatprep.subr.mxu1 %v232_v21 }
  0x11   :  { %517 = vmatpush3.msra.mxu0 %v39_v8  ;;  %p562_p4 = pnand %p561_p3, %p555_p0 }
  0x12   :  { %519 = vmatmul.mubr.msk.f32.vlgmr.msra.gmra.mxu0 %vm54_vm0, %v696_v9 }
  0xd2   :  { %v520_v15 = vpop.f32.mrf.mxu0 }
  0xd3   :  { %v133_v16 = vadd.f32 %v520_v15, %v464_v14 }
  0xd4   :  { %v127_v17 = vpop.f32.mrf.mxu0 }
  0xd5   :  { %v128_v18 = vadd.f32 %v464_v14, %v127_v17  ;;  %v137_v20 = vmax.f32 %v133_v16, 0.0 }
  0xd7   :  { %v136_v19 = vmax.f32 %v128_v18, 0.0 }
  0xd9   :  { %529 = vmatprep.mubr.msk.f32.mxu1 %vm149_vm1, %v136_v19 }
  0xda   :  { %530 = vmatmul.mubr.msk.f32.vlgmr.msra.gmra.mxu1 %vm149_vm1, %v137_v20 }
  0xdb   :  { %533 = vmatpush3.msra.mxu1 %v232_v21 }
  0xdc   :  { %534 = vmatprep.subr.mxu1 %v231_v22 }
  0xdd   :  { %535 = vmatpush3.msra.mxu1 %v231_v22 }
  0xde   :  { %539 = vmatprep.subr.mxu1 %v327_v28 }
 0x19a   :  { %v531_v24 = vpop.f32.mrf.mxu1 }
 0x19b   :  { %v228_v25 = vadd.f32 %v531_v24, %v467_v23 }
 0x19c   :  { %v222_v26 = vpop.f32.mrf.mxu1 }
 0x19d   :  { %417 = vst.msk [vmem:[#allocation2 + $0x8] sm:$0xff] %vm240_vm2, %v228_v25  ;;  %v223_v27 = vadd.f32 %v467_v23, %v222_v26 }
 0x19f   :  { %416 = vst.msk [vmem:[#allocation2] sm:$0xff] %vm240_vm2, %v223_v27  ;;  %536 = vmatprep.mubr.msk.f32.mxu1 %vm240_vm2, %v223_v27 }
 0x1a0   :  { %537 = vmatmul.mubr.msk.f32.vlgmr.msra.gmra.mxu1 %vm240_vm2, %v228_v25 }
 0x1a1   :  { %540 = vmatpush3.msra.mxu1 %v327_v28 }
 0x1a2   :  { %541 = vmatprep.subr.mxu1 %v326_v29 }
 0x1a3   :  { %542 = vmatpush3.msra.mxu1 %v326_v29 }
 0x1a4   :  { %543 = vmatprep.subr.mxu1 %v325_v30 }
 0x1a5   :  { %544 = vmatpush3.msra.mxu1 %v325_v30 }
 0x1a6   :  { %545 = vmatprep.subr.mxu1 %v324_v31 }
 0x1a7   :  { %546 = vmatpush3.msra.mxu1 %v324_v31 }
 0x260   :  { %v538_v33 = vpop.f32.mrf.mxu1 }
 0x261   :  { %v319_v34 = vadd.f32 %v538_v33, %v470_v32 }
 0x262   :  { %v313_v35 = vpop.f32.mrf.mxu1 }
 0x263   :  { %v314_v36 = vadd.f32 %v470_v32, %v313_v35  ;;  %v323_v38 = vmax.f32 %v319_v34, 0.0 }
 0x265   :  { %v322_v37 = vmax.f32 %v314_v36, 0.0 }
 0x267   :  { %547 = vmatprep.mubr.msk.f32.mxu1 %vm149_vm1, %v322_v37 }
 0x268   :  { %548 = vmatmul.mubr.msk.f32.vlgmr.msra.gmra.mxu1 %vm149_vm1, %v323_v38 }
 0x269   :  { %565 = shalt.err (!%p562_p4)
}
 0x26a   :  { %s599_s6 = smov 128   ;;  %s600_s1 = smov 8   ;;  %v473_v39 = vld [vmem:[%s770_s8] ss:$0 sm:$0xff] }
 0x26b   :  { %439 = dma.vmem_to_hbm [thread:$0]  %s434_s20, 256, %s771_s9, [#allocation3], %s599_s6, %s599_s6, %s600_s1  }
 0x26c   :  { %s601_s24 = smov [#allocation4]  }
 0x26d   :  { %s445_s25 = sshll.u32 %s601_s24, 4  ;;  %s446_s25 = int_to_ptr.vmem [resolvable:$true] %s445_s25 }
 0x26e   :  { %s574_s9 = scalar_lea.vmem %s446_s25, 256  ;;  %p579_p6 = scmp.lt.s32.totalorder %s446_s25, %s446_s25 }
 0x26f   :  { %p575_p5 = scmp.ne.s32.totalorder %s446_s25, %s574_s9  ;;  %p580_p7 = scmp.lt.s32.totalorder %s574_s9, %s574_s9 }
 0x271   :  { %p581_p8 = por %p580_p7, %p579_p6 }
 0x273   :  { %p582_p9 = pnand %p581_p8, %p575_p5 }
 0x328   :  { %v549_v40 = vpop.f32.mrf.mxu1 }
 0x329   :  { %v413_v41 = vadd.f32 %v549_v40, %v473_v39 }
 0x32a   :  { %v407_v42 = vpop.f32.mrf.mxu1 }
 0x32b   :  { %419 = vst.msk [vmem:[#allocation4 + $0x8] sm:$0xff] %vm54_vm0, %v413_v41  ;;  %v421_v43 = vsub.f32 %v413_v41, %v696_v9  ;;  %v408_v44 = vadd.f32 %v473_v39, %v407_v42 }
 0x32d   :  { %v423_v45 = vmul.f32 %v421_v43, %v421_v43  ;;  %418 = vst.msk [vmem:[#allocation4] sm:$0xff] %vm54_vm0, %v408_v44  ;;  %v420_v46 = vsub.f32 %v408_v44, %v674_v3 }
 0x32e   :  { %585 = shalt.err (!%p582_p9)
}
 0x32f   :  { %451 = dma.vmem_to_hbm [thread:$0]  %s446_s25, 256, %s772_s10, [#allocation5], %s599_s6, %s599_s6, %s600_s1   ;;  %v422_v47 = vmul.f32 %v420_v46, %v420_v46  ;;  %v425_v48 = vsel %vm54_vm0, %v423_v45, 0.0 }
 0x331   :  { %v424_v49 = vsel %vm54_vm0, %v422_v47, 0.0 }
 0x332   :  { %v426_v50 = vadd.f32 %v425_v48, %v424_v49 }
 0x334   :  { %427 = vst.msk [vmem:[%s773_s11] sm:$0xff] %vm54_vm0, %v426_v50 }
 0x335   :  { %594 = dma.done.wait [#allocation3], 256  }
 0x336   :  { %595 = vsyncadd [#allocation3], 4294967040 }
 0x337   :  { %596 = dma.done.wait [#allocation5], 256  }
 0x338   :  { %597 = vsyncadd [#allocation5], 4294967040 }
 0x339   :  { %462 = vsyncpa [#allocation3], 1 }
 0x33a   :  { %463 = vsyncpa [#allocation5], 1 }

</bundles_post_ra>
